<compile_context>
chip_gen: v5e
topology: v5e:2x2
jax: 0.10.0
libtpu: 0.0.40
codegen_flags: <defaults>
</compile_context>

<pallas_src>
import functools

import jax
import jax.numpy as jnp
from jax.experimental import pallas as pl
from jax.experimental.pallas import tpu as pltpu


_LANE = 128                        # TPU lane width: last dim of every tile
_MAX_TILE_ROWS = 4096              # i32 in + f32 out, double-buffered ~= 8 MiB VMEM
_MIN_GRID_STEPS = 4                # v7x: 2 TCs x >=2 balanced steps; steady pipeline on 1-TC chips
_FAST_PATH_MAX_ELEMS = 1 << 16     # below this, launch/layout overhead dominates -> XLA gather
_VMEM_LIMIT_BYTES = 32 * 1024 * 1024


def _group_lookup_kernel(val_ref, x_ref, o_ref, *, order):
    """val_ref: SMEM (order,) f32; x_ref: VMEM (TM,128) int; o_ref: VMEM (TM,128).

    Gather realized as a select network over the small static group order
    (pure VPU, zero cross-lane movement). Indices outside [0, order) yield an
    arbitrary table entry (PyTorch would raise). Out-of-bounds tail rows of a
    partial block hold unspecified data; they are masked off on the store and
    the integer compares/shifts on them are NaN-free, so this is safe.
    """
    idx = x_ref[...]
    if idx.dtype != jnp.int32:
        idx = idx.astype(jnp.int32)   # widen packed int8/int16 indices in-register

    if order > 1 and (order & (order - 1)) == 0:
        # Power-of-2 order: bit-decomposed select tree
        # (order-1 selects + log2(order) bit tests per element).
        level = [val_ref[g] for g in range(order)]    # SMEM scalars
        bit = 0
        while len(level) > 1:
            take_hi = ((idx >> bit) & 1) == 1
            level = [jnp.where(take_hi, level[j + 1], level[j])
                     for j in range(0, len(level), 2)]
            bit += 1
        out = level[0]
    else:
        # General order: chain initialized from entry 0 (saves the zeros init
        # and one compare+select vs the naive loop).
        out = jnp.full(idx.shape, val_ref[0], dtype=jnp.float32)
        for g in range(1, order):                     # static small order -> unrolled
            out = jnp.where(idx == g, val_ref[g], out)

    o_ref[...] = out.astype(o_ref.dtype)


def _pick_tile_rows(m_rows: int, sublane_pack: int) -> int:
    """Row-tile choice.

    Fat slabs amortize the ~0.35 us per-grid-step overhead, but the grid is
    kept at >= _MIN_GRID_STEPS roughly equal steps when the input permits so
    v7x's two TensorCores are load-balanced and 1-TC chips get a steady-state
    pipeline. Rows are a multiple of 8 * sublane packing (layout tiling for
    narrow int index dtypes)."""
    unit = 8 * sublane_pack
    if m_rows <= unit * _MIN_GRID_STEPS:
        return unit
    steps = max(_MIN_GRID_STEPS, -(-m_rows // _MAX_TILE_ROWS))
    rows = -(-m_rows // steps)            # balanced ceil-div split
    rows = -(-rows // unit) * unit        # round up to layout unit
    return min(rows, _MAX_TILE_ROWS)


class Group:
    """JAX/Pallas port of the PyTorch Group module (forward = table lookup).

    Performance notes for callers: indices fit in int8 for any realistic group
    order — passing int8/int16 indices cuts HBM read traffic 2-4x, and a bf16
    val_table halves output write traffic (the kernel computes in f32 and
    casts on store either way).
    """

    def __init__(self, mul_table):
        self.mul_table = jnp.asarray(mul_table, dtype=jnp.int32)
        self.order = int(self.mul_table.shape[0])
        # inverse table: for each g, the g_inv with mul_table[g, g_inv] == identity(0)
        gs, ginvs = jnp.nonzero(self.mul_table == 0)
        self.inv_table = ginvs[jnp.argsort(gs)].astype(jnp.int32)

    def default_val_table(self):
        return jnp.zeros((self.order,), jnp.float32).at[0].set(1.0)

    # ---- internal: launch the 2D (M,128) gather kernel -------------------
    def _pallas_gather_2d(self, x2d, table_f32, out_dtype, sublane_pack):
        m_rows = x2d.shape[0]
        tile_rows = _pick_tile_rows(m_rows, sublane_pack)
        grid = (-(-m_rows // tile_rows),)     # partial last block masked by Pallas
        n_elems = m_rows * _LANE
        cost = pl.CostEstimate(
            flops=2 * self.order * n_elems,
            transcendentals=0,
            bytes_accessed=(n_elems * (x2d.dtype.itemsize
                                       + jnp.dtype(out_dtype).itemsize)
                            + self.order * 4),
        )
        return pl.pallas_call(
            functools.partial(_group_lookup_kernel, order=self.order),
            out_shape=jax.ShapeDtypeStruct((m_rows, _LANE), out_dtype),
            grid=grid,
            in_specs=[
                pl.BlockSpec(memory_space=pltpu.MemorySpace.SMEM),   # val_table scalars
                pl.BlockSpec((tile_rows, _LANE), lambda i: (i, 0)),  # index tile
            ],
            out_specs=pl.BlockSpec((tile_rows, _LANE), lambda i: (i, 0)),
            compiler_params=pltpu.CompilerParams(
                dimension_semantics=("parallel",),
                vmem_limit_bytes=_VMEM_LIMIT_BYTES),
            cost_estimate=cost,
        )(table_f32, x2d)

    # ---- forward ----------------------------------------------------------
    def forward(self, x, val_table, force_pallas=False):
        assert val_table.shape[0] == self.order, (
            "Group function value table must be of the same size as the group "
            f"order, expect {self.order} got {val_table.shape[0]}.")
        out_dtype = val_table.dtype
        orig_shape = x.shape
        n = int(x.size)

        # Small-input fast path: pallas_call launch + layout plumbing would
        # exceed kernel time by orders of magnitude; plain XLA gather wins.
        if n == 0 or (n <= _FAST_PATH_MAX_ELEMS and not force_pallas):
            return val_table[x.astype(jnp.int32)]

        # Keep narrow integer index dtypes (less HBM read traffic); widen
        # inside the kernel instead of paying a full-array cast pass here.
        if x.dtype in (jnp.int8, jnp.int16, jnp.uint8, jnp.uint16):
            idx = x if (self.order - 1) <= jnp.iinfo(x.dtype).max else x.astype(jnp.int32)
        elif x.dtype in (jnp.int32, jnp.uint32):
            idx = x
        else:
            idx = x.astype(jnp.int32)
        sublane_pack = 4 // jnp.dtype(idx.dtype).itemsize   # 1 i32, 2 i16, 4 i8

        table_f32 = val_table.astype(jnp.float32)  # SMEM scalars (f32 compute, cast on store)
        flat = idx.reshape(-1)                     # row-major view, no data movement
        n_main = (n // _LANE) * _LANE

        if n_main == n:
            # Lane-aligned: single kernel, reshapes are metadata-only.
            out2d = self._pallas_gather_2d(
                flat.reshape(-1, _LANE), table_f32, out_dtype, sublane_pack)
            return out2d.reshape(orig_shape)

        if n_main == 0:
            # Fewer than 128 elements but force_pallas -> not worth a launch.
            return val_table[x.astype(jnp.int32)]

        # Ragged tail: Pallas on the 128-aligned prefix (no jnp.pad / post-slice
        # full-array passes), XLA gather on the <128-element tail, one concat.
        main2d = flat[:n_main].reshape(-1, _LANE)
        out_main = self._pallas_gather_2d(
            main2d, table_f32, out_dtype, sublane_pack).reshape(-1)
        out_tail = val_table[flat[n_main:].astype(jnp.int32)]
        return jnp.concatenate([out_main, out_tail]).reshape(orig_shape)

    __call__ = forward


if __name__ == "__main__":
    # Deterministic "parameters": Z4 cyclic group multiplication table.
    order = 4
    mul_table = jnp.array(
        [[(i + j) % order for j in range(order)] for i in range(order)],
        dtype=jnp.int32)
    group = Group(mul_table)

    key = jax.random.PRNGKey(0)
    k1, k2, k3, k4, k5, k6 = jax.random.split(key, 6)
    val_table = jax.random.normal(k2, (order,), dtype=jnp.float32)

    # 1) Main check: small spatial field of group elements, Pallas path forced
    #    (16 rows of 128 lanes -> 2 full row-blocks; power-of-2 select tree).
    x = jax.random.randint(k1, (2, 4, 16, 16), 0, order, dtype=jnp.int32)
    out = jax.block_until_ready(group(x, val_table, force_pallas=True))
    ref = val_table[x]
    assert out.shape == x.shape and out.dtype == val_table.dtype
    assert jnp.allclose(out, ref), "Pallas output mismatch vs reference gather"

    # 2) Partial last row-block (m_rows not a multiple of tile_rows).
    x2 = jax.random.randint(k3, (5, 4, 16, 16), 0, order, dtype=jnp.int32)
    out2 = jax.block_until_ready(group(x2, val_table, force_pallas=True))
    assert jnp.allclose(out2, val_table[x2]), "partial-block path mismatch"

    # 3) Ragged tail (element count not a multiple of 128 lanes ->
    #    aligned-prefix kernel + XLA tail gather, no pad/slice passes).
    x3 = jax.random.randint(k4, (7, 9, 5), 0, order, dtype=jnp.int32)
    out3 = jax.block_until_ready(group(x3, val_table, force_pallas=True))
    assert jnp.allclose(out3, val_table[x3]), "ragged-tail path mismatch"

    # 4) Small-input fast path (XLA gather, no Pallas launch).
    out4 = jax.block_until_ready(group(x, val_table))
    assert jnp.allclose(out4, ref), "fast-path mismatch"

    # 5) Narrow int8 indices through the Pallas path (in-kernel widening).
    x5 = jax.random.randint(k5, (4, 8, 128), 0, order, dtype=jnp.int32).astype(jnp.int8)
    out5 = jax.block_until_ready(group(x5, val_table, force_pallas=True))
    assert jnp.allclose(out5, val_table[x5.astype(jnp.int32)]), "int8-index path mismatch"

    # 6) Non-power-of-2 order (Z3) exercises the compare/select chain branch.
    mul3 = jnp.array([[(i + j) % 3 for j in range(3)] for i in range(3)], jnp.int32)
    g3 = Group(mul3)
    vt3 = jax.random.normal(k6, (3,), dtype=jnp.float32)
    x6 = jax.random.randint(k6, (2, 4, 16, 16), 0, 3, dtype=jnp.int32)
    out6 = jax.block_until_ready(g3(x6, vt3, force_pallas=True))
    assert jnp.allclose(out6, vt3[x6]), "non-power-of-2 order path mismatch"

    print("KERNEL_OK")
</pallas_src>

<mosaic_0001>
module attributes {stable_mosaic.version = 11 : i64} {
  func.func @_group_lookup_kernel(%arg0: i32, %arg1: memref<4xf32, #tpu.memory_space<smem>>, %arg2: memref<8x128xi32, #tpu.memory_space<vmem>>, %arg3: memref<8x128xf32, #tpu.memory_space<vmem>>) attributes {dimension_semantics = [#tpu.dimension_semantics<parallel>], iteration_bounds = array<i64: 2>, scalar_prefetch = 0 : i64, scratch_operands = 0 : i64, tpu.core_type = #tpu.core_type<tc>, window_params = [{transform_indices = @transform_0, window_bounds = array<i64: 4>}, {transform_indices = @transform_1, window_bounds = array<i64: 8, 128>}, {transform_indices = @transform_2, window_bounds = array<i64: 8, 128>}]} {
    %c0 = arith.constant 0 : index
    %c0_0 = arith.constant 0 : index
    %0 = vector.load %arg2[%c0, %c0_0] : memref<8x128xi32, #tpu.memory_space<vmem>>, vector<8x128xi32>
    %c0_1 = arith.constant 0 : index
    %1 = memref.load %arg1[%c0_1] : memref<4xf32, #tpu.memory_space<smem>>
    %c1 = arith.constant 1 : index
    %2 = memref.load %arg1[%c1] : memref<4xf32, #tpu.memory_space<smem>>
    %c2 = arith.constant 2 : index
    %3 = memref.load %arg1[%c2] : memref<4xf32, #tpu.memory_space<smem>>
    %c3 = arith.constant 3 : index
    %4 = memref.load %arg1[%c3] : memref<4xf32, #tpu.memory_space<smem>>
    %c0_i32 = arith.constant 0 : i32
    %5 = vector.broadcast %c0_i32 : i32 to vector<8x128xi32>
    %6 = arith.shrsi %0, %5 : vector<8x128xi32>
    %c1_i32 = arith.constant 1 : i32
    %7 = vector.broadcast %c1_i32 : i32 to vector<8x128xi32>
    %8 = arith.andi %6, %7 : vector<8x128xi32>
    %c1_i32_2 = arith.constant 1 : i32
    %9 = vector.broadcast %c1_i32_2 : i32 to vector<8x128xi32>
    %10 = arith.cmpi eq, %8, %9 : vector<8x128xi32>
    %11 = vector.broadcast %2 : f32 to vector<8x128xf32>
    %12 = vector.broadcast %1 : f32 to vector<8x128xf32>
    %13 = arith.select %10, %11, %12 : vector<8x128xi1>, vector<8x128xf32>
    %14 = vector.broadcast %4 : f32 to vector<8x128xf32>
    %15 = vector.broadcast %3 : f32 to vector<8x128xf32>
    %16 = arith.select %10, %14, %15 : vector<8x128xi1>, vector<8x128xf32>
    %c1_i32_3 = arith.constant 1 : i32
    %17 = vector.broadcast %c1_i32_3 : i32 to vector<8x128xi32>
    %18 = arith.shrsi %0, %17 : vector<8x128xi32>
    %c1_i32_4 = arith.constant 1 : i32
    %19 = vector.broadcast %c1_i32_4 : i32 to vector<8x128xi32>
    %20 = arith.andi %18, %19 : vector<8x128xi32>
    %c1_i32_5 = arith.constant 1 : i32
    %21 = vector.broadcast %c1_i32_5 : i32 to vector<8x128xi32>
    %22 = arith.cmpi eq, %20, %21 : vector<8x128xi32>
    %23 = arith.select %22, %16, %13 : vector<8x128xi1>, vector<8x128xf32>
    %c0_6 = arith.constant 0 : index
    %c0_7 = arith.constant 0 : index
    %24 = vector.load %arg3[%c0_6, %c0_7] : memref<8x128xf32, #tpu.memory_space<vmem>>, vector<8x128xf32>
    tpu.vector_store %arg3[%c0_6, %c0_7], %23 {strides = array<i32>} : memref<8x128xf32, #tpu.memory_space<vmem>>, vector<8x128xf32>,
    return
  }
  func.func @transform_0(%arg0: i32) -> i32 {
    %c0_i32 = arith.constant 0 : i32
    %c0_i32_0 = arith.constant 0 : i32
    return %c0_i32 : i32
  }
  func.func @transform_1(%arg0: i32) -> (i32, i32) {
    %c0_i32 = arith.constant 0 : i32
    %c0_i32_0 = arith.constant 0 : i32
    return %arg0, %c0_i32 : i32, i32
  }
  func.func @transform_2(%arg0: i32) -> (i32, i32) {
    %c0_i32 = arith.constant 0 : i32
    %c0_i32_0 = arith.constant 0 : i32
    return %arg0, %c0_i32 : i32, i32
  }
}

</mosaic_0001>

<bundles_post_ra>
// kernel: tpu_custom_call.1
= control target key start
LH: loop header
LB: loop body
LE: loop exit
PB: predicated region body
PF: predicated region fallthrough
CT: control target
= control target key end

     0   :  { %7 = vsyncpa [#allocation5], 0  ;;  %s636_s0 = inlined_call_operand.hbm [shape: f32[4], index: 0, kind: input, shape index: {}]   ;;  %s637_s1 = inlined_call_operand.hbm [shape: s32[16,128], index: 1, kind: input, shape index: {}]   ;;  %s638_s2 = inlined_call_operand.hbm [shape: f32[16,128], index: 2, kind: output, shape index: {}]  }
   0x1   :  { %8 = vsyncpa [#allocation3], 0 }
   0x2   :  { %10 = vsyncpa [#allocation3 + $0x1], 0 }
   0x3   :  { %11 = vsyncpa [#allocation4], 0 }
   0x4   :  { %13 = vsyncpa [#allocation4 + $0x1], 0  ;;  %s498_s9 = smov 0   ;;  %s500_s10 = smov 0  }
   0x5   :  { %s502_s11 = smov 0   ;;  %s504_s12 = smov 0  }
   0x6 LB: > { %s519_s13 = sadd.s32 4294967295, %s480_s12   ;;  %s291_s14 = sadd.s32 4294967294, %s480_s12   ;;  %s480_s12 = sphi %s504_s12, %s648_s12   ;;  %s476_s11 = sphi %s502_s11, %s647_s11   ;;  %s472_s10 = sphi %s500_s10, %s646_s10   ;;  %s468_s9 = sphi %s498_s9, %s645_s9  }
   0x7   : > { %p60_p0 = scmp.ne.s32.totalorder %s472_s10, %s468_s9  ;;  %p61_p1 = scmp.eq.s32.totalorder %s519_s13, 0 }
   0x8   : > { %p84_p2 = scmp.eq.s32.totalorder %s519_s13, 1  ;;  %p90_p3 = scmp.eq.s32.totalorder %s291_s14, 1 }
   0x9   : > { %p528_p4 = por %p61_p1, %p60_p0  ;;  %p292_p5 = scmp.ge.s32.totalorder %s480_s12, 1 }
   0xa   : > { %p533_p6 = por %p90_p3, %p60_p0  ;;  %p97_p7 = scmp.lt.s32.totalorder %s480_s12, 3 }
   0xb   : > { %s109_s19 = sshll.u32 %s636_s0, 4  ;;  %s549_s21 = sadd.s32 1, %s480_s12   ;;  %s110_s19 = int_to_ptr.hbm [resolvable:$true] %s109_s19 }
   0xc   : > { %p541_p8 = pnand %p292_p5, %p97_p7  ;;  %s44_s22 = ssub.s32 %s480_s12, %s549_s21 }
   0xd   : > { %p45_p12 = scmp.eq.s32.totalorder %s44_s22, 0  ;;  %s47_s23 = sadd.s32 1, %s476_s11 }
   0xe   : > { %p316_p10 = pneg %p541_p8  ;;  %p54_p13 = scmp.ne.s32.totalorder %s476_s11, %s472_s10 }
   0xf   : > { %s482_s24 = smov [#allocation2]   ;;  %p55_p0 = scmp.eq.s32.totalorder %s480_s12, 0 }
  0x10   : > { %p317_p11 = pnand %p316_p10, %p61_p1  ;;  %p564_p3 = por %p84_p2, %p54_p13 }
  0x11   : > { %s559_s25 = scalar_select %p45_p12, %s476_s11, %s47_s23  }
  0x12   : > { %319 = dma.hbm_to_smem (!%p317_p11), %s110_s19, 16, %s482_s24, [#allocation5]  }
  0x13   : > { %s120_s27 = sand.u32 1, %s476_s11   ;;  %p56_p5 = por %p55_p0, %p54_p13 }
  0x14   : > { %p329_p7 = scmp.lt.s32.totalorder %s480_s12, 2  ;;  %s295_s28 = sshll.u32 %s120_s27, 3 }
  0x15   : > { %s296_s29 = sshll.u32 %s480_s12, 3  ;;  %s124_s6 = scalar_lea.vmem [#allocation6], %s295_s28 }
  0x16   : > { %s128_s4 = scalar_lea.hbm %s637_s1, %s296_s29  ;;  %s132_s7 = sshll.u32 %s124_s6, 4  ;;  %s133_s7 = int_to_ptr.vmem [resolvable:$true] %s132_s7 }
  0x17   : > { %s130_s5 = sshll.u32 %s128_s4, 4  ;;  %p574_p10 = pnand %p329_p7, %p56_p5  ;;  %s131_s5 = int_to_ptr.hbm [resolvable:$true] %s130_s5 }
  0x18   : > { %s121_s14 = scalar_lea.sflag [#allocation3], %s120_s27  ;;  %s380_s17 = sshra.s32 %s131_s5, 4  ;;  %s381_s17 = int_to_ptr.hbm [resolvable:$true] %s380_s17 }
  0x19   : > { %s382_s18 = scalar_lea.hbm %s381_s17, 8  ;;  %p384_p11 = pneg %p574_p10 }
  0x1a   : > { %p383_p2 = scmp.ne.s32.totalorder %s381_s17, %s382_s18  ;;  %s387_s23 = scalar_lea.hbm %s637_s1, 16 }
  0x1b   : > { %p388_p0 = scmp.lt.s32.totalorder %s381_s17, %s637_s1  ;;  %p389_p5 = scmp.lt.s32.totalorder %s387_s23, %s382_s18 }
  0x1c   : > { %p385_p12 = pnand %p384_p11, %p383_p2 }
  0x1d   : > { %p390_p7 = por %p389_p5, %p388_p0 }
  0x1e   : > { %p386_p13 = pneg %p385_p12 }
  0x20   : > { %p391_p9 = pnand %p390_p7, %p386_p13 }
  0x22   : > { %394 = shalt.err (!%p391_p9)
}
  0x23   : > { %323 = dma.hbm_to_vmem [thread:$0]  (!%p574_p10), %s131_s5, 128, %s133_s7, %s121_s14  }
  0x24   : > { %141 = sbr.rel (%p541_p8) target bundleno = 65 (0x41), region = 28 }
  0x29   : > { %455 = dma.done.wait (%p61_p1), [#allocation5], 16  }
  0x2a   : > { %457 = vsyncadd (%p61_p1), [#allocation5], 4294967280  ;;  %s595_s27 = sand.u32 1, %s472_s10  }
  0x2b   : > { %s299_s29 = sshll.u32 %s595_s27, 3  ;;  %s149_s30 = scalar_lea.sflag [#allocation3], %s595_s27 }
  0x2c   : > { %s152_s3 = scalar_lea.vmem [#allocation6], %s299_s29 }
  0x2d   : > { %459 = dma.done.wait (%p528_p4), %s149_s30, 128  }
  0x2e   : > { %461 = vsyncadd (%p528_p4), %s149_s30, 4294967168 }
  0x2f   : > { %158 = sfence }
  0x30   : > { %v175_v0 = vld [vmem:[%s152_s3] sm:$0xff]  ;;  %s176_s20 = sld [smem:[#allocation2]]  ;;  %s305_s7 = sshll.u32 %s519_s13, 3 }
  0x31   : > { %s301_s4 = sld [smem:[#allocation2 + $0x1]]  ;;  %v180_v1 = vand.u32 1, %v175_v0  ;;  %v188_v2 = vshra.s32 %v175_v0, 1  ;;  %s204_s17 = scalar_lea.hbm %s638_s2, %s305_s7 }
  0x32   : > { %s302_s5 = sld [smem:[#allocation2 + $0x2]]  ;;  %s174_s15 = scalar_lea.vmem [#allocation7], %s299_s29 }
  0x33   : > { %s303_s6 = sld [smem:[#allocation2 + $0x3]]  ;;  %v189_v3 = vand.u32 1, %v188_v2  ;;  %vm181_vm0 = vcmp.eq.s32.totalorder %v180_v1, 1  ;;  %s206_s18 = sshll.u32 %s174_s15, 4  ;;  %s207_s18 = int_to_ptr.vmem [resolvable:$true] %s206_s18 }
  0x34   : > { %s208_s19 = sshll.u32 %s204_s17, 4  ;;  %s194_s13 = scalar_lea.sflag [#allocation4], %s595_s27  ;;  %s209_s19 = int_to_ptr.hbm [resolvable:$true] %s208_s19 }
  0x35   : > { %vm190_vm1 = vcmp.eq.s32.totalorder %v189_v3, 1  ;;  %s424_s22 = sshra.s32 %s209_s19, 4  ;;  %s430_s29 = scalar_lea.hbm %s638_s2, 16  ;;  %s425_s22 = int_to_ptr.hbm [resolvable:$true] %s424_s22 }
  0x36   : > { %v183_v4 = vstv %s176_s20  ;;  %s426_s23 = scalar_lea.hbm %s425_s22, 8  ;;  %p431_p9 = scmp.lt.s32.totalorder %s425_s22, %s638_s2 }
  0x37   : > { %v182_v5 = vstv %s301_s4  ;;  %p427_p1 = scmp.ne.s32.totalorder %s425_s22, %s426_s23  ;;  %p432_p10 = scmp.lt.s32.totalorder %s430_s29, %s426_s23 }
  0x38   : > { %v184_v6 = vsel %vm181_vm0, %v182_v5, %v183_v4  ;;  %v186_v7 = vstv %s302_s5 }
  0x39   : > { %v185_v8 = vstv %s303_s6  ;;  %p428_p4 = pnand %p427_p1, %p564_p3  ;;  %p433_p2 = por %p432_p10, %p431_p9 }
  0x3a   : > { %v187_v9 = vsel %vm181_vm0, %v185_v8, %v186_v7 }
  0x3b   : > { %v191_v10 = vsel %vm190_vm1, %v187_v9, %v184_v6  ;;  %p429_p8 = pneg %p428_p4 }
  0x3c   : > { %192 = vst [vmem:[%s174_s15] sm:$0xff] %v191_v10 }
  0x3d   : > { %p434_p11 = pnand %p433_p2, %p429_p8 }
  0x3f   : > { %437 = shalt.err (!%p434_p11)
}
  0x40   : > { %314 = dma.vmem_to_hbm [thread:$0]  (%p564_p3), %s207_s18, 128, %s209_s19, %s194_s13  }
  0x41 PF: > { %s220_s27 = sand.u32 1, %s468_s9   ;;  %p644_p12 = scmp.ge.s32.totalorder %s480_s12, 2 }
  0x42   : > { %s221_s20 = scalar_lea.sflag [#allocation4], %s220_s27 }
  0x43   : > { %p325_p13 = pnand %p644_p12, %p533_p6 }
  0x45   : > { %p326_p0 = pneg %p325_p13 }
  0x47   : > { %463 = dma.done.wait (%p326_p0), %s221_s20, 128  }
  0x48   : > { %465 = vsyncadd (%p326_p0), %s221_s20, 4294967168  ;;  %p16_p5 = scmp.ge.s32.totalorder %s549_s21, 4   ;;  %s645_s9 = smov %s472_s10 }
  0x49   : > { %s646_s10 = smov %s476_s11  ;;  %s647_s11 = smov %s559_s25 }
  0x4a   : > { %s648_s12 = smov %s549_s21  ;;  %18 = sbr.rel (!%p16_p5) target bundleno = 6 (0x6), region = 78 }
  0x4f   :  { %227 = vsyncpa [#allocation3], 1 }
  0x50   :  { %229 = vsyncpa [#allocation3 + $0x1], 1 }
  0x51   :  { %230 = vsyncpa [#allocation4], 1 }
  0x52   :  { %232 = vsyncpa [#allocation4 + $0x1], 1 }
  0x53   :  { %233 = vsyncpa [#allocation5], 1 }
  0x54   :  { %235 = vsyncpa [#allocation5 + $0x1], 1 }

</bundles_post_ra>
